<compile_context>
chip_gen: v5e
topology: v5e:2x2
jax: 0.10.0
libtpu: 0.0.40
codegen_flags: <defaults>
</compile_context>

<pallas_src>
import jax
import jax.numpy as jnp
from jax.experimental import pallas as pl
from jax.experimental.pallas import tpu as pltpu


def _round_up(x, m):
    return ((x + m - 1) // m) * m


def _fused_kernel(ids_ref, emb_ref, w1_ref, b1_ref, w2_ref, b2_ref, w3_ref, b3_ref, o_ref):
    # ids_ref: [TB, S, 1] int32 token ids
    # emb_ref: [Vp, Ep]  w1: [Ep, Hp]  w2: [Hp, Hp]  w3: [Hp, 128]  biases: [1, *]
    tb, seq, _ = ids_ref.shape
    vpad = emb_ref.shape[0]
    inv_s = 1.0 / seq                                   # static: mean over sequence

    # Fused gather + mean: per-row token counts (one-hot sum over S), then MXU matmul.
    ids = ids_ref[...]                                                     # [TB, S, 1]
    vocab_iota = jax.lax.broadcasted_iota(jnp.int32, (tb, seq, vpad), 2)   # [TB, S, Vp]
    onehot = (ids == vocab_iota).astype(jnp.float32)                       # [TB, S, Vp]
    counts = jnp.sum(onehot, axis=1) * inv_s                               # [TB, Vp]

    y = jnp.dot(counts, emb_ref[...], preferred_element_type=jnp.float32)  # mean emb [TB, Ep]
    y = jnp.maximum(jnp.dot(y, w1_ref[...], preferred_element_type=jnp.float32) + b1_ref[...], 0.0)
    y = jnp.maximum(jnp.dot(y, w2_ref[...], preferred_element_type=jnp.float32) + b2_ref[...], 0.0)
    y = jnp.dot(y, w3_ref[...], preferred_element_type=jnp.float32) + b3_ref[...]   # [TB, 128]
    o_ref[...] = y.astype(o_ref.dtype)                                     # lane-dense store


def init_params(key, vocab_size=50, emb_dim=300, hidden=150):
    """Mirror the module init: Linear weights ~ N(0,1), biases = 0, embedding given."""
    k_emb, k1, k2, k3 = jax.random.split(key, 4)
    embedding_matrix = jax.random.normal(k_emb, (vocab_size, emb_dim), jnp.float32)
    # torch stores W as [out, in]; we keep the transpose [in, out] for y @ W.
    w1 = jax.random.normal(k1, (hidden, emb_dim), jnp.float32).T      # [300, 150]
    b1 = jnp.zeros((1, hidden), jnp.float32)
    w2 = jax.random.normal(k2, (hidden, hidden), jnp.float32).T       # [150, 150]
    b2 = jnp.zeros((1, hidden), jnp.float32)
    w3 = jax.random.normal(k3, (1, hidden), jnp.float32).T            # [150, 1]
    b3 = jnp.zeros((1, 1), jnp.float32)
    return embedding_matrix, (w1, b1, w2, b2, w3, b3)


def pad_params(embedding_matrix, params):
    """One-time (outside the hot loop) zero-padding to 128-lane-aligned shapes."""
    w1, b1, w2, b2, w3, b3 = params
    V, E = embedding_matrix.shape
    H = w1.shape[1]
    Vp, Ep, Hp, OUTP = _round_up(V, 128), _round_up(E, 128), _round_up(H, 128), 128
    emb_p = jnp.zeros((Vp, Ep), jnp.float32).at[:V, :E].set(embedding_matrix)
    w1p = jnp.zeros((Ep, Hp), jnp.float32).at[:E, :H].set(w1)
    b1p = jnp.zeros((1, Hp), jnp.float32).at[:, :H].set(b1)
    w2p = jnp.zeros((Hp, Hp), jnp.float32).at[:H, :H].set(w2)
    b2p = jnp.zeros((1, Hp), jnp.float32).at[:, :H].set(b2)
    w3p = jnp.zeros((Hp, OUTP), jnp.float32).at[:H, :1].set(w3)
    b3p = jnp.zeros((1, OUTP), jnp.float32).at[:, :1].set(b3)
    return (emb_p, w1p, b1p, w2p, b2p, w3p, b3p)


def baseline_forward(x_ids, padded_params, *, batch_block=128):
    """x_ids: [B, S] (or [S]) int token ids. Returns logits [B, 1] float32.
    batch_block: 128 is a safe default for all generations; use 256 on v6e/v7x
    for large batches (MXU is 2x256), 128 on v5e. TODO(synk): for very long
    sequences, additionally chunk the one-hot count over S to bound VMEM."""
    emb_p, w1p, b1p, w2p, b2p, w3p, b3p = padded_params
    squeeze = False
    if x_ids.ndim == 1:                      # torch 2-D branch: single sequence
        x_ids = x_ids[None, :]
        squeeze = True
    B, S = x_ids.shape

    tb = min(batch_block, _round_up(B, 8))
    Bp = _round_up(B, tb)
    ids = jnp.zeros((Bp, S), jnp.int32).at[:B, :].set(x_ids.astype(jnp.int32))
    ids = ids[:, :, None]                    # [Bp, S, 1] so the kernel needs no reshape

    Vp, Ep = emb_p.shape
    Hp = w1p.shape[1]
    OUTP = w3p.shape[1]
    grid = (Bp // tb,)

    def resident(shape):                     # weights: same block for every grid step
        return pl.BlockSpec(shape, lambda i: tuple(0 for _ in shape))

    flops_per_row = 2 * (Vp * Ep + Ep * Hp + Hp * Hp + Hp * OUTP)
    param_bytes = 4 * (emb_p.size + w1p.size + b1p.size + w2p.size + b2p.size
                       + w3p.size + b3p.size)
    cost = pl.CostEstimate(
        flops=int(Bp * flops_per_row),
        transcendentals=0,
        bytes_accessed=int(4 * ids.size + param_bytes + 4 * Bp * OUTP),
    )

    out = pl.pallas_call(
        _fused_kernel,
        out_shape=jax.ShapeDtypeStruct((Bp, OUTP), jnp.float32),
        grid=grid,
        in_specs=[
            pl.BlockSpec((tb, S, 1), lambda i: (i, 0, 0)),   # id tile (tiny DMA)
            resident(emb_p.shape),
            resident(w1p.shape), resident(b1p.shape),
            resident(w2p.shape), resident(b2p.shape),
            resident(w3p.shape), resident(b3p.shape),
        ],
        out_specs=pl.BlockSpec((tb, OUTP), lambda i: (i, 0)),  # lane-dense output tile
        compiler_params=pltpu.CompilerParams(
            dimension_semantics=("parallel",),
            vmem_limit_bytes=32 * 1024 * 1024,   # safe on v5e/v6e (128MiB) and v7x (64MiB)
        ),
        cost_estimate=cost,
    )(ids, emb_p, w1p, b1p, w2p, b2p, w3p, b3p)

    logits = out[:B, :1]                     # drop batch padding + lane padding
    if squeeze:
        logits = logits[0]
    return logits


if __name__ == "__main__":
    key = jax.random.PRNGKey(0)
    k_params, k_ids = jax.random.split(key)

    VOCAB, EMB, HID, B, S = 50, 300, 150, 2, 8
    embedding_matrix, params = init_params(k_params, vocab_size=VOCAB, emb_dim=EMB, hidden=HID)
    padded = pad_params(embedding_matrix, params)
    x = jax.random.randint(k_ids, (B, S), 0, VOCAB, dtype=jnp.int32)

    logits = baseline_forward(x, padded)
    jax.block_until_ready(logits)

    # Pure-JAX reference of the original (un-fused, un-padded) math.
    emb = jnp.take(embedding_matrix, x, axis=0)          # [B, S, 300]
    y = jnp.mean(emb, axis=1)                            # [B, 300]
    w1, b1, w2, b2, w3, b3 = params
    y = jnp.maximum(y @ w1 + b1, 0.0)
    y = jnp.maximum(y @ w2 + b2, 0.0)
    ref = y @ w3 + b3                                    # [B, 1]

    assert logits.shape == (B, 1)
    # Tolerance accounts for MXU default-precision (bf16-pass) matmuls vs the
    # XLA reference; logits here have magnitude O(100) with N(0,1) weights.
    assert jnp.allclose(logits, ref, atol=2e-2, rtol=2e-2), float(jnp.max(jnp.abs(logits - ref)))

    print("KERNEL_OK")
</pallas_src>

<mosaic_0001>
module attributes {stable_mosaic.version = 11 : i64} {
  func.func @_fused_kernel(%arg0: i32, %arg1: memref<8x8x1xi32, #tpu.memory_space<vmem>>, %arg2: memref<128x384xf32, #tpu.memory_space<vmem>>, %arg3: memref<384x256xf32, #tpu.memory_space<vmem>>, %arg4: memref<1x256xf32, #tpu.memory_space<vmem>>, %arg5: memref<256x256xf32, #tpu.memory_space<vmem>>, %arg6: memref<1x256xf32, #tpu.memory_space<vmem>>, %arg7: memref<256x128xf32, #tpu.memory_space<vmem>>, %arg8: memref<1x128xf32, #tpu.memory_space<vmem>>, %arg9: memref<8x128xf32, #tpu.memory_space<vmem>>) attributes {dimension_semantics = [#tpu.dimension_semantics<parallel>], iteration_bounds = array<i64: 1>, scalar_prefetch = 0 : i64, scratch_operands = 0 : i64, tpu.core_type = #tpu.core_type<tc>, window_params = [{transform_indices = @transform_0, window_bounds = array<i64: 8, 8, 1>}, {pipeline_mode = #tpu.pipeline_mode<synchronous>, transform_indices = @transform_1, window_bounds = array<i64: 128, 384>}, {pipeline_mode = #tpu.pipeline_mode<synchronous>, transform_indices = @transform_2, window_bounds = array<i64: 384, 256>}, {pipeline_mode = #tpu.pipeline_mode<synchronous>, transform_indices = @transform_3, window_bounds = array<i64: 1, 256>}, {pipeline_mode = #tpu.pipeline_mode<synchronous>, transform_indices = @transform_4, window_bounds = array<i64: 256, 256>}, {pipeline_mode = #tpu.pipeline_mode<synchronous>, transform_indices = @transform_5, window_bounds = array<i64: 1, 256>}, {pipeline_mode = #tpu.pipeline_mode<synchronous>, transform_indices = @transform_6, window_bounds = array<i64: 256, 128>}, {pipeline_mode = #tpu.pipeline_mode<synchronous>, transform_indices = @transform_7, window_bounds = array<i64: 1, 128>}, {transform_indices = @transform_8, window_bounds = array<i64: 8, 128>}]} {
    %c0 = arith.constant 0 : index
    %c0_0 = arith.constant 0 : index
    %c0_1 = arith.constant 0 : index
    %0 = vector.load %arg1[%c0, %c0_0, %c0_1] : memref<8x8x1xi32, #tpu.memory_space<vmem>>, vector<8x8x1xi32>
    %1 = tpu.iota {dimensions = array<i32: 2>} : vector<8x8x128xi32>
    %2 = vector.broadcast %0 : vector<8x8x1xi32> to vector<8x8x128xi32>
    %3 = arith.cmpi eq, %2, %1 : vector<8x8x128xi32>
    %4 = arith.extui %3 : vector<8x8x128xi1> to vector<8x8x128xi32>
    %5 = arith.sitofp %4 : vector<8x8x128xi32> to vector<8x8x128xf32>
    %cst = arith.constant dense<0.000000e+00> : vector<8x128xf32>
    %6 = vector.multi_reduction <add>, %5, %cst [1] : vector<8x8x128xf32> to vector<8x128xf32>
    %cst_2 = arith.constant 1.250000e-01 : f32
    %7 = vector.broadcast %cst_2 : f32 to vector<8x128xf32>
    %8 = arith.mulf %6, %7 : vector<8x128xf32>
    %c0_3 = arith.constant 0 : index
    %c0_4 = arith.constant 0 : index
    %9 = vector.load %arg2[%c0_3, %c0_4] : memref<128x384xf32, #tpu.memory_space<vmem>>, vector<128x384xf32>
    %cst_5 = arith.constant dense<0.000000e+00> : vector<8x384xf32>
    %10 = tpu.matmul %8, %9, %cst_5 {dimension_numbers = #tpu.dot_dimension_numbers<[1], [0], [0], [1], [0, 0, 1, 1], [], []>} : vector<8x128xf32>, vector<128x384xf32>, vector<8x384xf32> -> vector<8x384xf32>
    %c0_6 = arith.constant 0 : index
    %c0_7 = arith.constant 0 : index
    %11 = vector.load %arg3[%c0_6, %c0_7] : memref<384x256xf32, #tpu.memory_space<vmem>>, vector<384x256xf32>
    %cst_8 = arith.constant dense<0.000000e+00> : vector<8x256xf32>
    %12 = tpu.matmul %10, %11, %cst_8 {dimension_numbers = #tpu.dot_dimension_numbers<[1], [0], [0], [1], [0, 0, 1, 1], [], []>} : vector<8x384xf32>, vector<384x256xf32>, vector<8x256xf32> -> vector<8x256xf32>
    %c0_9 = arith.constant 0 : index
    %c0_10 = arith.constant 0 : index
    %13 = vector.load %arg4[%c0_9, %c0_10] : memref<1x256xf32, #tpu.memory_space<vmem>>, vector<1x256xf32>
    %14 = vector.broadcast %13 : vector<1x256xf32> to vector<8x256xf32>
    %15 = arith.addf %12, %14 : vector<8x256xf32>
    %cst_11 = arith.constant 0.000000e+00 : f32
    %16 = vector.broadcast %cst_11 : f32 to vector<8x256xf32>
    %17 = arith.maximumf %15, %16 : vector<8x256xf32>
    %c0_12 = arith.constant 0 : index
    %c0_13 = arith.constant 0 : index
    %18 = vector.load %arg5[%c0_12, %c0_13] : memref<256x256xf32, #tpu.memory_space<vmem>>, vector<256x256xf32>
    %cst_14 = arith.constant dense<0.000000e+00> : vector<8x256xf32>
    %19 = tpu.matmul %17, %18, %cst_14 {dimension_numbers = #tpu.dot_dimension_numbers<[1], [0], [0], [1], [0, 0, 1, 1], [], []>} : vector<8x256xf32>, vector<256x256xf32>, vector<8x256xf32> -> vector<8x256xf32>
    %c0_15 = arith.constant 0 : index
    %c0_16 = arith.constant 0 : index
    %20 = vector.load %arg6[%c0_15, %c0_16] : memref<1x256xf32, #tpu.memory_space<vmem>>, vector<1x256xf32>
    %21 = vector.broadcast %20 : vector<1x256xf32> to vector<8x256xf32>
    %22 = arith.addf %19, %21 : vector<8x256xf32>
    %cst_17 = arith.constant 0.000000e+00 : f32
    %23 = vector.broadcast %cst_17 : f32 to vector<8x256xf32>
    %24 = arith.maximumf %22, %23 : vector<8x256xf32>
    %c0_18 = arith.constant 0 : index
    %c0_19 = arith.constant 0 : index
    %25 = vector.load %arg7[%c0_18, %c0_19] : memref<256x128xf32, #tpu.memory_space<vmem>>, vector<256x128xf32>
    %cst_20 = arith.constant dense<0.000000e+00> : vector<8x128xf32>
    %26 = tpu.matmul %24, %25, %cst_20 {dimension_numbers = #tpu.dot_dimension_numbers<[1], [0], [0], [1], [0, 0, 1, 1], [], []>} : vector<8x256xf32>, vector<256x128xf32>, vector<8x128xf32> -> vector<8x128xf32>
    %c0_21 = arith.constant 0 : index
    %c0_22 = arith.constant 0 : index
    %27 = vector.load %arg8[%c0_21, %c0_22] : memref<1x128xf32, #tpu.memory_space<vmem>>, vector<1x128xf32>
    %28 = vector.broadcast %27 : vector<1x128xf32> to vector<8x128xf32>
    %29 = arith.addf %26, %28 : vector<8x128xf32>
    %c0_23 = arith.constant 0 : index
    %c0_24 = arith.constant 0 : index
    %30 = vector.load %arg9[%c0_23, %c0_24] : memref<8x128xf32, #tpu.memory_space<vmem>>, vector<8x128xf32>
    tpu.vector_store %arg9[%c0_23, %c0_24], %29 {strides = array<i32>} : memref<8x128xf32, #tpu.memory_space<vmem>>, vector<8x128xf32>,
    return
  }
  func.func @transform_0(%arg0: i32) -> (i32, i32, i32) {
    %c0_i32 = arith.constant 0 : i32
    %c0_i32_0 = arith.constant 0 : i32
    %c0_i32_1 = arith.constant 0 : i32
    return %arg0, %c0_i32, %c0_i32_0 : i32, i32, i32
  }
  func.func @transform_1(%arg0: i32) -> (i32, i32) {
    %c0_i32 = arith.constant 0 : i32
    %c0_i32_0 = arith.constant 0 : i32
    %c0_i32_1 = arith.constant 0 : i32
    return %c0_i32, %c0_i32_0 : i32, i32
  }
  func.func @transform_2(%arg0: i32) -> (i32, i32) {
    %c0_i32 = arith.constant 0 : i32
    %c0_i32_0 = arith.constant 0 : i32
    %c0_i32_1 = arith.constant 0 : i32
    return %c0_i32, %c0_i32_0 : i32, i32
  }
  func.func @transform_3(%arg0: i32) -> (i32, i32) {
    %c0_i32 = arith.constant 0 : i32
    %c0_i32_0 = arith.constant 0 : i32
    %c0_i32_1 = arith.constant 0 : i32
    return %c0_i32, %c0_i32_0 : i32, i32
  }
  func.func @transform_4(%arg0: i32) -> (i32, i32) {
    %c0_i32 = arith.constant 0 : i32
    %c0_i32_0 = arith.constant 0 : i32
    %c0_i32_1 = arith.constant 0 : i32
    return %c0_i32, %c0_i32_0 : i32, i32
  }
  func.func @transform_5(%arg0: i32) -> (i32, i32) {
    %c0_i32 = arith.constant 0 : i32
    %c0_i32_0 = arith.constant 0 : i32
    %c0_i32_1 = arith.constant 0 : i32
    return %c0_i32, %c0_i32_0 : i32, i32
  }
  func.func @transform_6(%arg0: i32) -> (i32, i32) {
    %c0_i32 = arith.constant 0 : i32
    %c0_i32_0 = arith.constant 0 : i32
    %c0_i32_1 = arith.constant 0 : i32
    return %c0_i32, %c0_i32_0 : i32, i32
  }
  func.func @transform_7(%arg0: i32) -> (i32, i32) {
    %c0_i32 = arith.constant 0 : i32
    %c0_i32_0 = arith.constant 0 : i32
    %c0_i32_1 = arith.constant 0 : i32
    return %c0_i32, %c0_i32_0 : i32, i32
  }
  func.func @transform_8(%arg0: i32) -> (i32, i32) {
    %c0_i32 = arith.constant 0 : i32
    %c0_i32_0 = arith.constant 0 : i32
    return %arg0, %c0_i32 : i32, i32
  }
}

</mosaic_0001>

<bundles_post_ra>
// kernel: tpu_custom_call.1
= control target key start
LH: loop header
LB: loop body
LE: loop exit
PB: predicated region body
PF: predicated region fallthrough
CT: control target
= control target key end

     0   :  { %13 = vsyncpa [#allocation3], 0  ;;  %s1092_s0 = inlined_call_operand.vmem [shape: s32[8,8,1], index: 0, kind: input, shape index: {}]   ;;  %s1093_s1 = inlined_call_operand.hbm [shape: f32[128,384], index: 1, kind: input, shape index: {}]   ;;  %s1094_s2 = inlined_call_operand.hbm [shape: f32[384,256], index: 2, kind: input, shape index: {}]   ;;  %s1095_s3 = inlined_call_operand.vmem [shape: f32[1,256], index: 3, kind: input, shape index: {}]   ;;  %s1096_s4 = inlined_call_operand.hbm [shape: f32[256,256], index: 4, kind: input, shape index: {}]   ;;  %s1097_s5 = inlined_call_operand.vmem [shape: f32[1,256], index: 5, kind: input, shape index: {}]   ;;  %s1098_s6 = inlined_call_operand.hbm [shape: f32[256,128], index: 6, kind: input, shape index: {}]   ;;  %s1099_s7 = inlined_call_operand.vmem [shape: f32[1,128], index: 7, kind: input, shape index: {}]   ;;  %s1100_s8 = inlined_call_operand.hbm [shape: f32[8,128], index: 8, kind: output, shape index: {}]  }
   0x1   :  { %14 = vsyncpa [#allocation6], 0 }
   0x2   :  { %15 = vsyncpa [#allocation9], 0  ;;  %s36_s29 = sshll.u32 %s1094_s2, 4  ;;  %s37_s29 = int_to_ptr.hbm [resolvable:$true] %s36_s29 }
   0x3   :  { %16 = vsyncpa [#allocation4], 0  ;;  %s963_s30 = smov [#allocation5]   ;;  %s23_s12 = sshll.u32 %s1093_s1, 4  ;;  %s24_s12 = int_to_ptr.hbm [resolvable:$true] %s23_s12 }
   0x4   :  { %s38_s9 = sshll.u32 %s963_s30, 4  ;;  %s964_s13 = smov 256   ;;  %s39_s9 = int_to_ptr.vmem [resolvable:$true] %s38_s9 }
   0x5   :  { %s965_s14 = smov 16   ;;  %s966_s15 = smov [#allocation2]  }
   0x6   :  { %44 = dma.hbm_to_vmem [thread:$0]  %s37_s29, 12288, %s39_s9, [#allocation6], %s964_s13, %s964_s13, %s965_s14  }
   0x7   :  { %s25_s16 = sshll.u32 %s966_s15, 4  ;;  %s967_s17 = smov 384   ;;  %s26_s16 = int_to_ptr.vmem [resolvable:$true] %s25_s16 }
   0x8   :  { %s968_s18 = smov 24   ;;  %s51_s20 = sshll.u32 %s1096_s4, 4  ;;  %s52_s20 = int_to_ptr.hbm [resolvable:$true] %s51_s20 }
   0x9   :  { %31 = dma.hbm_to_vmem [thread:$0]  %s24_s12, 6144, %s26_s16, [#allocation3], %s967_s17, %s967_s17, %s968_s18  }
   0xa   :  { %s969_s21 = smov [#allocation7]   ;;  %s66_s24 = sshll.u32 %s1098_s6, 4  ;;  %s67_s24 = int_to_ptr.hbm [resolvable:$true] %s66_s24 }
   0xb   :  { %s53_s22 = sshll.u32 %s969_s21, 4  ;;  %s970_s25 = smov [#allocation8]   ;;  %s54_s22 = int_to_ptr.vmem [resolvable:$true] %s53_s22 }
   0xc   :  { %59 = dma.hbm_to_vmem [thread:$0]  %s52_s20, 8192, %s54_s22, [#allocation6], %s964_s13, %s964_s13, %s965_s14  }
   0xd   :  { %s68_s26 = sshll.u32 %s970_s25, 4  ;;  %s971_s27 = smov 128   ;;  %s69_s26 = int_to_ptr.vmem [resolvable:$true] %s68_s26 }
   0xe   :  { %s972_s28 = smov 8  }
   0xf   :  { %74 = dma.hbm_to_vmem [thread:$0]  %s67_s24, 4096, %s69_s26, [#allocation9], %s971_s27, %s971_s27, %s972_s28  }
  0x10   :  { %955 = dma.done.wait [#allocation3], 6144  }
  0x11   :  { %956 = vsyncadd [#allocation3], 4294961152 }
  0x12   :  { %957 = dma.done.wait [#allocation6], 20480  }
  0x13   :  { %958 = vsyncadd [#allocation6], 4294946816 }
  0x14   :  { %959 = dma.done.wait [#allocation9], 4096  }
  0x15   :  { %960 = vsyncadd [#allocation9], 4294963200  ;;  %v973_v0 = vmov 0   ;;  %v95_v1 = vld [vmem:[%s1092_s0 + $0x10] sm:$0xff]  ;;  %v93_v2 = vld [vmem:[%s1092_s0] sm:$0xff]  ;;  %v101_v33 = vlaneseq  ;;  %v974_v51 = vmov 0.0  }
  0x16   :  { %832 = vset.pattern.permute.xlu1 %v973_v0  ;;  %831 = vset.pattern.permute.xlu0 %v973_v0  ;;  %v97_v3 = vld [vmem:[%s1092_s0 + $0x20] sm:$0xff]  ;;  %v96_v4 = vld [vmem:[%s1092_s0 + $0x18] sm:$0xff]  ;;  %v94_v5 = vld [vmem:[%s1092_s0 + $0x8] sm:$0xff]  ;;  %vm263_vm8 = vcmask 1041409   ;;  %vm265_vm9 = vcmask 1042434   ;;  %vm267_vm10 = vcmask 1043459  }
  0x17   :  { %833 = vset.pattern.permute.xlu2 %v973_v0  ;;  %110 = vperm.xlu1 %832, %v95_v1   ;;  %v98_v6 = vld [vmem:[%s1092_s0 + $0x28] sm:$0xff]  ;;  %v100_v7 = vld [vmem:[%s1092_s0 + $0x38] sm:$0xff]  ;;  %v99_v8 = vld [vmem:[%s1092_s0 + $0x30] sm:$0xff]  ;;  %v1057_v41 = vand.u32 127, %v101_v33  ;;  %vm269_vm11 = vcmask 1044484   ;;  %vm271_vm12 = vcmask 1045509  }
  0x18   :  { %104 = vperm.xlu0 %831, %v93_v2   ;;  %116 = vperm.xlu2 %833, %v97_v3   ;;  %v252_v9 = vld [vmem:[#allocation2 + $0x168] sm:$0xff]  ;;  %v253_v10 = vld [vmem:[#allocation2 + $0x170] sm:$0xff]  ;;  %v254_v11 = vld [vmem:[#allocation2 + $0x178] sm:$0xff]  ;;  %vm273_vm13 = vcmask 1046534   ;;  %vm275_vm14 = vcmask 1047559   ;;  %s798_s26 = sshll.u32 %s1100_s8, 4  ;;  %s799_s26 = int_to_ptr.hbm [resolvable:$true] %s798_s26 }
  0x19   :  { %278 = vmatpush.msra.mxu0 %v252_v9  ;;  %298 = vmatpush.msra.mxu1 %v253_v10  ;;  %v249_v12 = vld [vmem:[#allocation2 + $0x150] sm:$0xff]  ;;  %v250_v13 = vld [vmem:[#allocation2 + $0x158] sm:$0xff]  ;;  %v251_v14 = vld [vmem:[#allocation2 + $0x160] sm:$0xff] }
  0x1a   :  { %318 = vmatpush.msra.mxu2 %v254_v11  ;;  %v246_v15 = vld [vmem:[#allocation2 + $0x138] sm:$0xff]  ;;  %v247_v16 = vld [vmem:[#allocation2 + $0x140] sm:$0xff]  ;;  %v248_v17 = vld [vmem:[#allocation2 + $0x148] sm:$0xff] }
  0x1b   :  { %279 = vmatpush.msra.mxu0 %v249_v12  ;;  %299 = vmatpush.msra.mxu1 %v250_v13  ;;  %v243_v18 = vld [vmem:[#allocation2 + $0x120] sm:$0xff]  ;;  %v244_v19 = vld [vmem:[#allocation2 + $0x128] sm:$0xff]  ;;  %v245_v20 = vld [vmem:[#allocation2 + $0x130] sm:$0xff] }
  0x1c   :  { %319 = vmatpush.msra.mxu2 %v251_v14  ;;  %v240_v21 = vld [vmem:[#allocation2 + $0x108] sm:$0xff]  ;;  %v241_v22 = vld [vmem:[#allocation2 + $0x110] sm:$0xff]  ;;  %v242_v23 = vld [vmem:[#allocation2 + $0x118] sm:$0xff] }
  0x1d   :  { %280 = vmatpush.msra.mxu0 %v246_v15  ;;  %300 = vmatpush.msra.mxu1 %v247_v16  ;;  %v237_v24 = vld [vmem:[#allocation2 + $0xf0] sm:$0xff]  ;;  %v238_v25 = vld [vmem:[#allocation2 + $0xf8] sm:$0xff]  ;;  %v239_v26 = vld [vmem:[#allocation2 + $0x100] sm:$0xff] }
  0x1e   :  { %320 = vmatpush.msra.mxu2 %v248_v17  ;;  %v234_v27 = vld [vmem:[#allocation2 + $0xd8] sm:$0xff]  ;;  %v235_v28 = vld [vmem:[#allocation2 + $0xe0] sm:$0xff]  ;;  %v236_v29 = vld [vmem:[#allocation2 + $0xe8] sm:$0xff] }
  0x1f   :  { %113 = vperm.xlu1 %832, %v96_v4   ;;  %281 = vmatpush.msra.mxu0 %v243_v18  ;;  %v231_v30 = vld [vmem:[#allocation2 + $0xc0] sm:$0xff]  ;;  %v232_v31 = vld [vmem:[#allocation2 + $0xc8] sm:$0xff]  ;;  %v233_v32 = vld [vmem:[#allocation2 + $0xd0] sm:$0xff] }
  0x20   :  { %107 = vperm.xlu0 %831, %v94_v5   ;;  %119 = vperm.xlu2 %833, %v98_v6   ;;  %v228_v35 = vld [vmem:[#allocation2 + $0xa8] sm:$0xff]  ;;  %v229_v36 = vld [vmem:[#allocation2 + $0xb0] sm:$0xff]  ;;  %v230_v37 = vld [vmem:[#allocation2 + $0xb8] sm:$0xff] }
  0x21   :  { %301 = vmatpush.msra.mxu1 %v244_v19  ;;  %321 = vmatpush.msra.mxu2 %v245_v20  ;;  %v225_v38 = vld [vmem:[#allocation2 + $0x90] sm:$0xff]  ;;  %v226_v39 = vld [vmem:[#allocation2 + $0x98] sm:$0xff]  ;;  %v227_v40 = vld [vmem:[#allocation2 + $0xa0] sm:$0xff] }
  0x22   :  { %282 = vmatpush.msra.mxu0 %v240_v21  ;;  %v222_v42 = vld [vmem:[#allocation2 + $0x78] sm:$0xff]  ;;  %v223_v43 = vld [vmem:[#allocation2 + $0x80] sm:$0xff]  ;;  %v224_v44 = vld [vmem:[#allocation2 + $0x88] sm:$0xff] }
  0x23   :  { %302 = vmatpush.msra.mxu1 %v241_v22  ;;  %322 = vmatpush.msra.mxu2 %v242_v23  ;;  %v219_v45 = vld [vmem:[#allocation2 + $0x60] sm:$0xff]  ;;  %v220_v46 = vld [vmem:[#allocation2 + $0x68] sm:$0xff]  ;;  %v221_v47 = vld [vmem:[#allocation2 + $0x70] sm:$0xff] }
  0x24   :  { %283 = vmatpush.msra.mxu0 %v237_v24  ;;  %v216_v48 = vld [vmem:[#allocation2 + $0x48] sm:$0xff]  ;;  %v217_v49 = vld [vmem:[#allocation2 + $0x50] sm:$0xff]  ;;  %v218_v50 = vld [vmem:[#allocation2 + $0x58] sm:$0xff] }
  0x25   :  { %303 = vmatpush.msra.mxu1 %v238_v25  ;;  %323 = vmatpush.msra.mxu2 %v239_v26  ;;  %v213_v54 = vld [vmem:[#allocation2 + $0x30] sm:$0xff]  ;;  %v214_v55 = vld [vmem:[#allocation2 + $0x38] sm:$0xff]  ;;  %v215_v56 = vld [vmem:[#allocation2 + $0x40] sm:$0xff] }
  0x26   :  { %284 = vmatpush.msra.mxu0 %v234_v27  ;;  %v210_v57 = vld [vmem:[#allocation2 + $0x18] sm:$0xff]  ;;  %v211_v58 = vld [vmem:[#allocation2 + $0x20] sm:$0xff]  ;;  %v212_v59 = vld [vmem:[#allocation2 + $0x28] sm:$0xff] }
  0x27   :  { %125 = vperm.xlu1 %832, %v100_v7   ;;  %304 = vmatpush.msra.mxu1 %v235_v28  ;;  %v207_v63 = vld [vmem:[#allocation2] sm:$0xff]  ;;  %v208_v0 = vld [vmem:[#allocation2 + $0x8] sm:$0xff]  ;;  %v209_v1 = vld [vmem:[#allocation2 + $0x10] sm:$0xff] }
  0x28   :  { %122 = vperm.xlu0 %831, %v99_v8   ;;  %324 = vmatpush.msra.mxu2 %v236_v29  ;;  %v368_v8 = vld [vmem:[#allocation5 + $0xf0] sm:$0xff]  ;;  %v366_v10 = vld [vmem:[#allocation5 + $0xe0] sm:$0xff] }
  0x29   :  { %285 = vmatpush.msra.mxu0 %v231_v30  ;;  %305 = vmatpush.msra.mxu1 %v232_v31  ;;  %v400_v9 = vld [vmem:[#allocation5 + $0x1f0] sm:$0xff]  ;;  %v398_v13 = vld [vmem:[#allocation5 + $0x1e0] sm:$0xff] }
  0x2a   :  { %325 = vmatpush.msra.mxu2 %v233_v32  ;;  %440 = vmatpush.msra.mxu3 %v368_v8  ;;  %v364_v15 = vld [vmem:[#allocation5 + $0xd0] sm:$0xff]  ;;  %v362_v22 = vld [vmem:[#allocation5 + $0xc0] sm:$0xff] }
  0x2b   :  { %286 = vmatpush.msra.mxu0 %v228_v35  ;;  %306 = vmatpush.msra.mxu1 %v229_v36  ;;  %v396_v17 = vld [vmem:[#allocation5 + $0x1d0] sm:$0xff]  ;;  %v394_v23 = vld [vmem:[#allocation5 + $0x1c0] sm:$0xff]  ;;  %v369_v35 = vld [vmem:[#allocation5 + $0xf8] sm:$0xff] }
  0x2c   :  { %326 = vmatpush.msra.mxu2 %v230_v37  ;;  %441 = vmatpush.msra.mxu3 %v366_v10  ;;  %v360_v28 = vld [vmem:[#allocation5 + $0xb0] sm:$0xff] }
  0x2d   :  { %287 = vmatpush.msra.mxu0 %v225_v38  ;;  %307 = vmatpush.msra.mxu1 %v226_v39  ;;  %v392_v31 = vld [vmem:[#allocation5 + $0x1b0] sm:$0xff]  ;;  %v390_v38 = vld [vmem:[#allocation5 + $0x1a0] sm:$0xff]  ;;  %v367_v39 = vld [vmem:[#allocation5 + $0xe8] sm:$0xff] }
  0x2e   :  { %327 = vmatpush.msra.mxu2 %v227_v40  ;;  %442 = vmatpush.msra.mxu3 %v364_v15  ;;  %v348_v15 = vld [vmem:[#allocation5 + $0x50] sm:$0xff] }
  0x2f   :  { %288 = vmatpush.msra.mxu0 %v222_v42  ;;  %308 = vmatpush.msra.mxu1 %v223_v43  ;;  %v356_v43 = vld [vmem:[#allocation5 + $0x90] sm:$0xff] }
  0x30   :  { %328 = vmatpush.msra.mxu2 %v224_v44  ;;  %443 = vmatpush.msra.mxu3 %v362_v22  ;;  %v426_v22 = vld [vmem:[#allocation5 + $0x2c0] sm:$0xff] }
  0x31   :  { %289 = vmatpush.msra.mxu0 %v219_v45  ;;  %309 = vmatpush.msra.mxu1 %v220_v46  ;;  %v388_v46 = vld [vmem:[#allocation5 + $0x190] sm:$0xff] }
  0x32   :  { %329 = vmatpush.msra.mxu2 %v221_v47  ;;  %444 = vmatpush.msra.mxu3 %v360_v28  ;;  %v365_v47 = vld [vmem:[#allocation5 + $0xd8] sm:$0xff] }
  0x33   :  { %290 = vmatpush.msra.mxu0 %v216_v48  ;;  %310 = vmatpush.msra.mxu1 %v217_v49 }
  0x34   :  { %330 = vmatpush.msra.mxu2 %v218_v50 }
  0x35   :  { %291 = vmatpush.msra.mxu0 %v213_v54  ;;  %311 = vmatpush.msra.mxu1 %v214_v55  ;;  %v432_v54 = vld [vmem:[#allocation5 + $0x2f0] sm:$0xff] }
  0x36   :  { %331 = vmatpush.msra.mxu2 %v215_v56 }
  0x37   :  { %292 = vmatpush.msra.mxu0 %v210_v57  ;;  %312 = vmatpush.msra.mxu1 %v211_v58  ;;  %v386_v57 = vld [vmem:[#allocation5 + $0x180] sm:$0xff]  ;;  %v363_v58 = vld [vmem:[#allocation5 + $0xc8] sm:$0xff] }
  0x38   :  { %332 = vmatpush.msra.mxu2 %v212_v59 }
  0x39   :  { %293 = vmatpush.msra.mxu0 %v207_v63  ;;  %313 = vmatpush.msra.mxu1 %v208_v0  ;;  %v352_v63 = vld [vmem:[#allocation5 + $0x70] sm:$0xff] }
  0x3a   :  { %333 = vmatpush.msra.mxu2 %v209_v1 }
  0x3b   :  { %460 = vmatpush.msrb.mxu0 %v400_v9  ;;  %480 = vmatpush.msrb.mxu1 %v432_v54 }
  0x3c   :  { %500 = vmatpush.msrb.mxu2 %v369_v35  ;;  %v355_v35 = vld [vmem:[#allocation5 + $0x88] sm:$0xff] }
  0x3d   :  { %461 = vmatpush.msrb.mxu0 %v398_v13 }
  0x3e   :  { %501 = vmatpush.msrb.mxu2 %v367_v39 }
  0x3f   :  { %462 = vmatpush.msrb.mxu0 %v396_v17 }
  0x40   :  { %502 = vmatpush.msrb.mxu2 %v365_v47 }
  0x41   :  { %463 = vmatpush.msrb.mxu0 %v394_v23 }
  0x42   :  { %503 = vmatpush.msrb.mxu2 %v363_v58 }
  0x43   :  { %464 = vmatpush.msrb.mxu0 %v392_v31  ;;  %v424_v31 = vld [vmem:[#allocation5 + $0x2b0] sm:$0xff] }
  0x45   :  { %465 = vmatpush.msrb.mxu0 %v390_v38 }
  0x47   :  { %466 = vmatpush.msrb.mxu0 %v388_v46 }
  0x49   :  { %467 = vmatpush.msrb.mxu0 %v386_v57  ;;  %v418_v57 = vld [vmem:[#allocation5 + $0x280] sm:$0xff] }
  0x72   :  { %v117_v34 = vpop.permute.xlu2 %116 }
  0x73   :  { %vm131_vm0 = vcmp.eq.s32.totalorder %v117_v34, %v1057_v41  ;;  %v358_v34 = vld [vmem:[#allocation5 + $0xa0] sm:$0xff] }
  0x74   :  { %v814_v52 = vsel %vm131_vm0, 1.0, %v974_v51  ;;  %445 = vmatpush.msra.mxu3 %v358_v34  ;;  %v344_v34 = vld [vmem:[#allocation5 + $0x30] sm:$0xff] }
  0x75   :  { %v175_v60 = vrot.slane %v814_v52, 4 }
  0x76   :  { %446 = vmatpush.msra.mxu3 %v356_v43  ;;  %v342_v43 = vld [vmem:[#allocation5 + $0x20] sm:$0xff] }
  0x77   :  { %v176_v7 = vadd.f32 %v814_v52, %v175_v60 }
  0x79   :  { %v177_v18 = vrot.slane %v176_v7, 2 }
  0x7a   :  { %v120_v53 = vpop.permute.xlu2 %119 }
  0x7b   :  { %vm132_vm1 = vcmp.eq.s32.totalorder %v120_v53, %v1057_v41  ;;  %v178_v32 = vadd.f32 %v177_v18, %v176_v7  ;;  %v354_v53 = vld [vmem:[#allocation5 + $0x80] sm:$0xff]  ;;  %v361_v7 = vld [vmem:[#allocation5 + $0xb8] sm:$0xff] }
  0x7c   :  { %v815_v6 = vsel %vm132_vm1, 1.0, %v974_v51  ;;  %447 = vmatpush.msra.mxu3 %v354_v53  ;;  %504 = vmatpush.msrb.mxu2 %v361_v7  ;;  %v351_v53 = vld [vmem:[#allocation5 + $0x68] sm:$0xff]  ;;  %v429_v7 = vld [vmem:[#allocation5 + $0x2d8] sm:$0xff] }
  0x7d   :  { %v181_v14 = vrot.slane %v815_v6, 4  ;;  %v179_v48 = vrot.slane %v178_v32, 1 }
  0x7e   :  { %448 = vmatpush.msra.mxu3 %v352_v63  ;;  %v401_v63 = vld [vmem:[#allocation5 + $0x1f8] sm:$0xff] }
  0x7f   :  { %v182_v25 = vadd.f32 %v815_v6, %v181_v14  ;;  %v350_v6 = vld [vmem:[#allocation5 + $0x60] sm:$0xff]  ;;  %v180_v13 = vadd.f32 %v179_v48, %v178_v32 }
  0x80   :  { %449 = vmatpush.msra.mxu3 %v350_v6  ;;  %v374_v48 = vld [vmem:[#allocation5 + $0x120] sm:$0xff] }
  0x81   :  { %v183_v42 = vrot.slane %v182_v25, 2  ;;  %v414_v6 = vld [vmem:[#allocation5 + $0x260] sm:$0xff] }
  0x82   :  { %450 = vmatpush.msra.mxu3 %v348_v15  ;;  %v341_v15 = vld [vmem:[#allocation5 + $0x18] sm:$0xff] }
  0x83   :  { %v184_v60 = vadd.f32 %v183_v42, %v182_v25  ;;  %v357_v25 = vld [vmem:[#allocation5 + $0x98] sm:$0xff]  ;;  %v422_v42 = vld [vmem:[#allocation5 + $0x2a0] sm:$0xff] }
  0x85   :  { %v185_v14 = vrot.slane %v184_v60, 1 }
  0x87   :  { %v186_v32 = vadd.f32 %v185_v14, %v184_v60  ;;  %v338_v60 = vld [vmem:[#allocation5] sm:$0xff]  ;;  %v425_v14 = vld [vmem:[#allocation5 + $0x2b8] sm:$0xff] }
  0x89   :  { %v111_v61 = vpop.permute.xlu1 %110 }
  0x8a   :  { %v105_v62 = vpop.permute.xlu0 %104  ;;  %vm129_vm2 = vcmp.eq.s32.totalorder %v111_v61, %v1057_v41 }
  0x8b   :  { %vm127_vm3 = vcmp.eq.s32.totalorder %v105_v62, %v1057_v41  ;;  %v812_v2 = vsel %vm129_vm2, 1.0, %v974_v51 }
  0x8c   :  { %v810_v3 = vsel %vm127_vm3, 1.0, %v974_v51  ;;  %v163_v4 = vrot.slane %v812_v2, 4 }
  0x8d   :  { %v151_v5 = vrot.slane %v810_v3, 4 }
  0x8e   :  { %v164_v11 = vadd.f32 %v812_v2, %v163_v4  ;;  %v384_v4 = vld [vmem:[#allocation5 + $0x170] sm:$0xff] }
  0x8f   :  { %v152_v12 = vadd.f32 %v810_v3, %v151_v5  ;;  %468 = vmatpush.msrb.mxu0 %v384_v4  ;;  %v431_v4 = vld [vmem:[#allocation5 + $0x2e8] sm:$0xff] }
  0x90   :  { %v165_v19 = vrot.slane %v164_v11, 2 }
  0x91   :  { %v153_v16 = vrot.slane %v152_v12, 2  ;;  %v114_v20 = vpop.permute.xlu1 %113 }
  0x92   :  { %v108_v21 = vpop.permute.xlu0 %107  ;;  %vm130_vm4 = vcmp.eq.s32.totalorder %v114_v20, %v1057_v41  ;;  %v166_v33 = vadd.f32 %v165_v19, %v164_v11  ;;  %v382_v11 = vld [vmem:[#allocation5 + $0x160] sm:$0xff] }
  0x93   :  { %vm128_vm5 = vcmp.eq.s32.totalorder %v108_v21, %v1057_v41  ;;  %v154_v24 = vadd.f32 %v153_v16, %v152_v12  ;;  %v813_v26 = vsel %vm130_vm4, 1.0, %v974_v51  ;;  %v428_v12 = vld [vmem:[#allocation5 + $0x2d0] sm:$0xff]  ;;  %v359_v16 = vld [vmem:[#allocation5 + $0xa8] sm:$0xff]  ;;  %469 = vmatpush.msrb.mxu0 %v382_v11 }
  0x94   :  { %v811_v27 = vsel %vm128_vm5, 1.0, %v974_v51  ;;  %v169_v29 = vrot.slane %v813_v26, 4  ;;  %v167_v49 = vrot.slane %v166_v33, 1  ;;  %v380_v21 = vld [vmem:[#allocation5 + $0x150] sm:$0xff]  ;;  %505 = vmatpush.msrb.mxu2 %v359_v16  ;;  %v343_v11 = vld [vmem:[#allocation5 + $0x28] sm:$0xff] }
  0x95   :  { %v157_v30 = vrot.slane %v811_v27, 4  ;;  %v155_v40 = vrot.slane %v154_v24, 1  ;;  %470 = vmatpush.msrb.mxu0 %v380_v21  ;;  %v391_v16 = vld [vmem:[#allocation5 + $0x1a8] sm:$0xff] }
  0x96   :  { %v170_v36 = vadd.f32 %v813_v26, %v169_v29  ;;  %v168_v5 = vadd.f32 %v167_v49, %v166_v33  ;;  %506 = vmatpush.msrb.mxu2 %v357_v25  ;;  %v420_v49 = vld [vmem:[#allocation5 + $0x290] sm:$0xff]  ;;  %v419_v21 = vld [vmem:[#allocation5 + $0x288] sm:$0xff] }
  0x97   :  { %v158_v37 = vadd.f32 %v811_v27, %v157_v30  ;;  %v156_v59 = vadd.f32 %v155_v40, %v154_v24  ;;  %v346_v24 = vld [vmem:[#allocation5 + $0x40] sm:$0xff]  ;;  %v376_v40 = vld [vmem:[#allocation5 + $0x130] sm:$0xff]  ;;  %v415_v25 = vld [vmem:[#allocation5 + $0x268] sm:$0xff] }
  0x98   :  { %v171_v44 = vrot.slane %v170_v36, 2  ;;  %v201_v23 = vmul.f32 0.125, %v168_v5  ;;  %v378_v30 = vld [vmem:[#allocation5 + $0x140] sm:$0xff]  ;;  %451 = vmatpush.msra.mxu3 %v346_v24  ;;  %507 = vmatpush.msrb.mxu2 %v355_v35  ;;  %v397_v5 = vld [vmem:[#allocation5 + $0x1d8] sm:$0xff]  ;;  %v383_v24 = vld [vmem:[#allocation5 + $0x168] sm:$0xff] }
  0x99   :  { %v159_v45 = vrot.slane %v158_v37, 2  ;;  %v126_v50 = vpop.permute.xlu1 %125  ;;  %v199_v17 = vmul.f32 0.125, %v156_v59  ;;  %471 = vmatpush.msrb.mxu0 %v378_v30  ;;  %v379_v30 = vld [vmem:[#allocation5 + $0x148] sm:$0xff]  ;;  %v404_v35 = vld [vmem:[#allocation5 + $0x210] sm:$0xff] }
  0x9a   :  { %v123_v52 = vpop.permute.xlu0 %122  ;;  %v172_v55 = vadd.f32 %v171_v44, %v170_v36  ;;  %vm134_vm6 = vcmp.eq.s32.totalorder %v126_v50, %v1057_v41  ;;  %v203_v36 = vmul.f32 0.125, %v180_v13  ;;  %v353_v44 = vld [vmem:[#allocation5 + $0x78] sm:$0xff]  ;;  %452 = vmatpush.msra.mxu3 %v344_v34  ;;  %v204_v50 = vmul.f32 0.125, %v186_v32  ;;  %v410_v13 = vld [vmem:[#allocation5 + $0x240] sm:$0xff] }
  0x9b   :  { %v160_v56 = vadd.f32 %v159_v45, %v158_v37  ;;  %vm133_vm7 = vcmp.eq.s32.totalorder %v123_v52, %v1057_v41  ;;  %v817_v61 = vsel %vm134_vm6, 1.0, %v974_v51  ;;  %v430_v41 = vld [vmem:[#allocation5 + $0x2e0] sm:$0xff]  ;;  %472 = vmatpush.msrb.mxu0 %v376_v40  ;;  %v340_v52 = vld [vmem:[#allocation5 + $0x10] sm:$0xff]  ;;  %508 = vmatpush.msrb.mxu2 %v353_v44  ;;  %v409_v34 = vld [vmem:[#allocation5 + $0x238] sm:$0xff] }
  0x9c   :  { %v816_v62 = vsel %vm133_vm7, 1.0, %v974_v51  ;;  %v173_v0 = vrot.slane %v172_v55, 1  ;;  %v193_v2 = vrot.slane %v817_v61, 4  ;;  %481 = vmatpush.msrb.mxu1 %v430_v41  ;;  %453 = vmatpush.msra.mxu3 %v342_v43  ;;  %v347_v41 = vld [vmem:[#allocation5 + $0x48] sm:$0xff]  ;;  %v406_v32 = vld [vmem:[#allocation5 + $0x220] sm:$0xff]  ;;  %v405_v40 = vld [vmem:[#allocation5 + $0x218] sm:$0xff] }
  0x9d   :  { %v161_v1 = vrot.slane %v160_v56, 1  ;;  %v187_v3 = vrot.slane %v816_v62, 4  ;;  %473 = vmatpush.msrb.mxu0 %v374_v48  ;;  %509 = vmatpush.msrb.mxu2 %v351_v53  ;;  %v403_v43 = vld [vmem:[#allocation5 + $0x208] sm:$0xff]  ;;  %v592_v44 = vld [vmem:[#allocation7 + $0xf0] sm:$0xff]  ;;  %v622_v48 = vld [vmem:[#allocation7 + $0x1e0] sm:$0xff] }
  0x9e   :  { %v174_v8 = vadd.f32 %v173_v0, %v172_v55  ;;  %v194_v10 = vadd.f32 %v817_v61, %v193_v2  ;;  %482 = vmatpush.msrb.mxu1 %v428_v12  ;;  %454 = vmatpush.msra.mxu3 %v340_v52  ;;  %v433_v0 = vld [vmem:[#allocation5 + $0x2f8] sm:$0xff]  ;;  %v399_v2 = vld [vmem:[#allocation5 + $0x1e8] sm:$0xff]  ;;  %v618_v52 = vld [vmem:[#allocation7 + $0x1c0] sm:$0xff] }
  0x9f   :  { %v162_v9 = vadd.f32 %v161_v1, %v160_v56  ;;  %v188_v51 = vadd.f32 %v816_v62, %v187_v3  ;;  %v372_v56 = vld [vmem:[#allocation5 + $0x110] sm:$0xff]  ;;  %v370_v62 = vld [vmem:[#allocation5 + $0x100] sm:$0xff]  ;;  %v349_v1 = vld [vmem:[#allocation5 + $0x58] sm:$0xff] }
  0xa0   :  { %v195_v19 = vrot.slane %v194_v10, 2  ;;  %v202_v26 = vmul.f32 0.125, %v174_v8  ;;  %483 = vmatpush.msrb.mxu1 %v426_v22  ;;  %474 = vmatpush.msrb.mxu0 %v372_v56  ;;  %v416_v3 = vld [vmem:[#allocation5 + $0x270] sm:$0xff]  ;;  %v345_v8 = vld [vmem:[#allocation5 + $0x38] sm:$0xff] }
  0xa1   :  { %v200_v18 = vmul.f32 0.125, %v162_v9  ;;  %v189_v20 = vrot.slane %v188_v51, 2  ;;  %455 = vmatpush.msra.mxu3 %v338_v60  ;;  %510 = vmatpush.msrb.mxu2 %v349_v1  ;;  %v395_v9 = vld [vmem:[#allocation5 + $0x1c8] sm:$0xff]  ;;  %v393_v12 = vld [vmem:[#allocation5 + $0x1b8] sm:$0xff]  ;;  %v584_v53 = vld [vmem:[#allocation7 + $0xb0] sm:$0xff] }
  0xa2   :  { %v196_v28 = vadd.f32 %v195_v19, %v194_v10  ;;  %484 = vmatpush.msrb.mxu1 %v424_v31  ;;  %475 = vmatpush.msrb.mxu0 %v370_v62  ;;  %v412_v10 = vld [vmem:[#allocation5 + $0x250] sm:$0xff]  ;;  %v421_v19 = vld [vmem:[#allocation5 + $0x298] sm:$0xff]  ;;  %v411_v31 = vld [vmem:[#allocation5 + $0x248] sm:$0xff] }
  0xa3   :  { %v264_v27 = vsel %vm263_vm8, %v200_v18, %v199_v17  ;;  %v190_v29 = vadd.f32 %v189_v20, %v188_v51  ;;  %520 = vmatpush.msrb.mxu3 %v401_v63  ;;  %511 = vmatpush.msrb.mxu2 %v347_v41  ;;  %v427_v51 = vld [vmem:[#allocation5 + $0x2c8] sm:$0xff]  ;;  %v389_v18 = vld [vmem:[#allocation5 + $0x198] sm:$0xff]  ;;  %v580_v56 = vld [vmem:[#allocation7 + $0x90] sm:$0xff] }
  0xa4   :  { %v266_v33 = vsel %vm265_vm9, %v201_v23, %v264_v27  ;;  %v197_v37 = vrot.slane %v196_v28, 1  ;;  %485 = vmatpush.msrb.mxu1 %v422_v42  ;;  %v423_v17 = vld [vmem:[#allocation5 + $0x2a8] sm:$0xff]  ;;  %v385_v22 = vld [vmem:[#allocation5 + $0x178] sm:$0xff] }
  0xa5   :  { %v191_v38 = vrot.slane %v190_v29, 1  ;;  %v268_v39 = vsel %vm267_vm10, %v202_v26, %v266_v33  ;;  %521 = vmatpush.msrb.mxu3 %v399_v2  ;;  %512 = vmatpush.msrb.mxu2 %v345_v8  ;;  %v387_v20 = vld [vmem:[#allocation5 + $0x188] sm:$0xff]  ;;  %v417_v23 = vld [vmem:[#allocation5 + $0x278] sm:$0xff] }
  0xa6   :  { %v198_v45 = vadd.f32 %v197_v37, %v196_v28  ;;  %v270_v47 = vsel %vm269_vm11, %v203_v36, %v268_v39  ;;  %486 = vmatpush.msrb.mxu1 %v420_v49  ;;  %v381_v26 = vld [vmem:[#allocation5 + $0x158] sm:$0xff]  ;;  %v408_v28 = vld [vmem:[#allocation5 + $0x230] sm:$0xff]  ;;  %v375_v36 = vld [vmem:[#allocation5 + $0x128] sm:$0xff] }
  0xa7   :  { %v192_v46 = vadd.f32 %v191_v38, %v190_v29  ;;  %v272_v58 = vsel %vm271_vm12, %v204_v50, %v270_v47  ;;  %522 = vmatpush.msrb.mxu3 %v397_v5  ;;  %513 = vmatpush.msrb.mxu2 %v343_v11  ;;  %v413_v27 = vld [vmem:[#allocation5 + $0x258] sm:$0xff]  ;;  %v339_v29 = vld [vmem:[#allocation5 + $0x8] sm:$0xff]  ;;  %v402_v38 = vld [vmem:[#allocation5 + $0x200] sm:$0xff] }
  0xa8   :  { %v206_v55 = vmul.f32 0.125, %v198_v45  ;;  %487 = vmatpush.msrb.mxu1 %v418_v57  ;;  %v377_v33 = vld [vmem:[#allocation5 + $0x138] sm:$0xff]  ;;  %v407_v37 = vld [vmem:[#allocation5 + $0x228] sm:$0xff]  ;;  %v590_v45 = vld [vmem:[#allocation7 + $0xe0] sm:$0xff] }
  0xa9   :  { %v205_v54 = vmul.f32 0.125, %v192_v46  ;;  %523 = vmatpush.msrb.mxu3 %v395_v9  ;;  %514 = vmatpush.msrb.mxu2 %v341_v15  ;;  %v373_v39 = vld [vmem:[#allocation5 + $0x118] sm:$0xff]  ;;  %v371_v42 = vld [vmem:[#allocation5 + $0x108] sm:$0xff]  ;;  %v624_v46 = vld [vmem:[#allocation7 + $0x1f0] sm:$0xff] }
  0xaa   :  { %488 = vmatpush.msrb.mxu1 %v416_v3  ;;  %v588_v47 = vld [vmem:[#allocation7 + $0xd0] sm:$0xff]  ;;  %v586_v49 = vld [vmem:[#allocation7 + $0xc0] sm:$0xff]  ;;  %v591_v62 = vld [vmem:[#allocation7 + $0xe8] sm:$0xff] }
  0xab   :  { %v274_v59 = vsel %vm273_vm13, %v205_v54, %v272_v58  ;;  %524 = vmatpush.msrb.mxu3 %v393_v12  ;;  %515 = vmatpush.msrb.mxu2 %v339_v29  ;;  %v620_v50 = vld [vmem:[#allocation7 + $0x1d0] sm:$0xff]  ;;  %v578_v57 = vld [vmem:[#allocation7 + $0x80] sm:$0xff]  ;;  %v593_v58 = vld [vmem:[#allocation7 + $0xf8] sm:$0xff] }
  0xac   :  { %v276_v61 = vsel %vm275_vm14, %v206_v55, %v274_v59  ;;  %489 = vmatpush.msrb.mxu1 %v414_v6  ;;  %v616_v54 = vld [vmem:[#allocation7 + $0x1b0] sm:$0xff]  ;;  %v582_v55 = vld [vmem:[#allocation7 + $0xa0] sm:$0xff]  ;;  %v623_v63 = vld [vmem:[#allocation7 + $0x1e8] sm:$0xff] }
  0xad   :  { %294 = vmatmul.f32.vlgmr.msra.gmra.mxu0 %v276_v61  ;;  %314 = vmatmul.f32.vlgmr.msra.gmra.mxu1 %v276_v61  ;;  %v621_v1 = vld [vmem:[#allocation7 + $0x1d8] sm:$0xff]  ;;  %v587_v2 = vld [vmem:[#allocation7 + $0xc8] sm:$0xff]  ;;  %v576_v9 = vld [vmem:[#allocation7 + $0x70] sm:$0xff] }
  0xae   :  { %334 = vmatmul.f32.vlgmr.msra.gmra.mxu2 %v276_v61  ;;  %540 = vmatpush.msra.mxu0 %v433_v0  ;;  %v625_v61 = vld [vmem:[#allocation7 + $0x1f8] sm:$0xff]  ;;  %v619_v41 = vld [vmem:[#allocation7 + $0x1c8] sm:$0xff]  ;;  %v574_v12 = vld [vmem:[#allocation7 + $0x60] sm:$0xff] }
  0xaf   :  { %490 = vmatpush.msrb.mxu1 %v412_v10  ;;  %525 = vmatpush.msrb.mxu3 %v391_v16  ;;  %v589_v0 = vld [vmem:[#allocation7 + $0xd8] sm:$0xff]  ;;  %v583_v5 = vld [vmem:[#allocation7 + $0xa8] sm:$0xff]  ;;  %v614_v10 = vld [vmem:[#allocation7 + $0x1a0] sm:$0xff] }
  0xb0   :  { %541 = vmatpush.msra.mxu0 %v431_v4  ;;  %652 = vmatpush.msra.mxu2 %v624_v46  ;;  %v585_v4 = vld [vmem:[#allocation7 + $0xb8] sm:$0xff]  ;;  %v579_v8 = vld [vmem:[#allocation7 + $0x88] sm:$0xff]  ;;  %v572_v16 = vld [vmem:[#allocation7 + $0x50] sm:$0xff] }
  0xb1   :  { %491 = vmatpush.msrb.mxu1 %v410_v13  ;;  %526 = vmatpush.msrb.mxu3 %v389_v18  ;;  %v617_v6 = vld [vmem:[#allocation7 + $0x1b8] sm:$0xff]  ;;  %v615_v11 = vld [vmem:[#allocation7 + $0x1a8] sm:$0xff]  ;;  %v612_v13 = vld [vmem:[#allocation7 + $0x190] sm:$0xff] }
  0xb2   :  { %542 = vmatpush.msra.mxu0 %v429_v7  ;;  %653 = vmatpush.msra.mxu2 %v622_v48  ;;  %v581_v7 = vld [vmem:[#allocation7 + $0x98] sm:$0xff]  ;;  %v604_v29 = vld [vmem:[#allocation7 + $0x150] sm:$0xff]  ;;  %v595_v46 = vld [vmem:[#allocation7 + $0x108] sm:$0xff] }
  0xb3   :  { %527 = vmatpush.msrb.mxu3 %v387_v20  ;;  %492 = vmatpush.msrb.mxu1 %v408_v28  ;;  %v613_v15 = vld [vmem:[#allocation7 + $0x198] sm:$0xff]  ;;  %v570_v20 = vld [vmem:[#allocation7 + $0x40] sm:$0xff]  ;;  %v744_v48 = vld [vmem:[#allocation8 + $0xf0] sm:$0xff] }
  0xb4   :  { %543 = vmatpush.msra.mxu0 %v427_v51  ;;  %654 = vmatpush.msra.mxu2 %v620_v50  ;;  %v577_v51 = vld [vmem:[#allocation7 + $0x78] sm:$0xff]  ;;  %v566_v28 = vld [vmem:[#allocation7 + $0x20] sm:$0xff]  ;;  %v728_v50 = vld [vmem:[#allocation8 + $0x70] sm:$0xff] }
  0xb5   :  { %528 = vmatpush.msrb.mxu3 %v385_v22  ;;  %493 = vmatpush.msrb.mxu1 %v406_v32  ;;  %v573_v18 = vld [vmem:[#allocation7 + $0x58] sm:$0xff]  ;;  %v571_v22 = vld [vmem:[#allocation7 + $0x48] sm:$0xff]  ;;  %v564_v32 = vld [vmem:[#allocation7 + $0x10] sm:$0xff] }
  0xb6   :  { %544 = vmatpush.msra.mxu0 %v425_v14  ;;  %655 = vmatpush.msra.mxu2 %v618_v52  ;;  %v575_v14 = vld [vmem:[#allocation7 + $0x68] sm:$0xff] }
  0xb7   :  { %529 = vmatpush.msrb.mxu3 %v383_v24  ;;  %494 = vmatpush.msrb.mxu1 %v404_v35  ;;  %v568_v24 = vld [vmem:[#allocation7 + $0x30] sm:$0xff]  ;;  %v603_v35 = vld [vmem:[#allocation7 + $0x148] sm:$0xff] }
  0xb8   :  { %545 = vmatpush.msra.mxu0 %v423_v17  ;;  %656 = vmatpush.msra.mxu2 %v616_v54  ;;  %v610_v17 = vld [vmem:[#allocation7 + $0x180] sm:$0xff]  ;;  %v743_v52 = vld [vmem:[#allocation8 + $0xe8] sm:$0xff] }
  0xb9   :  { %530 = vmatpush.msrb.mxu3 %v381_v26  ;;  %495 = vmatpush.msrb.mxu1 %v402_v38  ;;  %v569_v26 = vld [vmem:[#allocation7 + $0x38] sm:$0xff]  ;;  %v563_v38 = vld [vmem:[#allocation7 + $0x8] sm:$0xff]  ;;  %v742_v54 = vld [vmem:[#allocation8 + $0xe0] sm:$0xff] }
  0xba   :  { %546 = vmatpush.msra.mxu0 %v421_v19  ;;  %657 = vmatpush.msra.mxu2 %v614_v10  ;;  %v611_v19 = vld [vmem:[#allocation7 + $0x188] sm:$0xff] }
  0xbb   :  { %531 = vmatpush.msrb.mxu3 %v379_v30  ;;  %632 = vmatpush.msra.mxu1 %v592_v44  ;;  %v567_v30 = vld [vmem:[#allocation7 + $0x28] sm:$0xff]  ;;  %v597_v44 = vld [vmem:[#allocation7 + $0x118] sm:$0xff] }
  0xbc   :  { %547 = vmatpush.msra.mxu0 %v419_v21  ;;  %658 = vmatpush.msra.mxu2 %v612_v13  ;;  %v608_v21 = vld [vmem:[#allocation7 + $0x170] sm:$0xff] }
  0xbd   :  { %532 = vmatpush.msrb.mxu3 %v377_v33  ;;  %633 = vmatpush.msra.mxu1 %v590_v45  ;;  %v602_v33 = vld [vmem:[#allocation7 + $0x140] sm:$0xff] }
  0xbe   :  { %548 = vmatpush.msra.mxu0 %v417_v23  ;;  %659 = vmatpush.msra.mxu2 %v610_v17  ;;  %v609_v23 = vld [vmem:[#allocation7 + $0x178] sm:$0xff]  ;;  %v594_v45 = vld [vmem:[#allocation7 + $0x100] sm:$0xff] }
  0xbf   :  { %533 = vmatpush.msrb.mxu3 %v375_v36  ;;  %634 = vmatpush.msra.mxu1 %v588_v47  ;;  %v562_v36 = vld [vmem:[#allocation7] sm:$0xff]  ;;  %v745_v47 = vld [vmem:[#allocation8 + $0xf8] sm:$0xff] }
  0xc0   :  { %549 = vmatpush.msra.mxu0 %v415_v25  ;;  %660 = vmatpush.msra.mxu2 %v608_v21  ;;  %v606_v25 = vld [vmem:[#allocation7 + $0x160] sm:$0xff]  ;;  %v721_v17 = vld [vmem:[#allocation8 + $0x38] sm:$0xff]  ;;  %v719_v21 = vld [vmem:[#allocation8 + $0x28] sm:$0xff] }
  0xc1   :  { %534 = vmatpush.msrb.mxu3 %v373_v39  ;;  %635 = vmatpush.msra.mxu1 %v586_v49  ;;  %v601_v39 = vld [vmem:[#allocation7 + $0x138] sm:$0xff] }
  0xc2   :  { %550 = vmatpush.msra.mxu0 %v413_v27  ;;  %661 = vmatpush.msra.mxu2 %v606_v25  ;;  %v607_v27 = vld [vmem:[#allocation7 + $0x168] sm:$0xff]  ;;  %v729_v49 = vld [vmem:[#allocation8 + $0x78] sm:$0xff] }
  0xc3   :  { %535 = vmatpush.msrb.mxu3 %v371_v42  ;;  %636 = vmatpush.msra.mxu1 %v584_v53  ;;  %v599_v42 = vld [vmem:[#allocation7 + $0x128] sm:$0xff]  ;;  %v717_v25 = vld [vmem:[#allocation8 + $0x18] sm:$0xff] }
  0xc4   :  { %551 = vmatpush.msra.mxu0 %v411_v31  ;;  %662 = vmatpush.msra.mxu2 %v604_v29  ;;  %v605_v31 = vld [vmem:[#allocation7 + $0x158] sm:$0xff]  ;;  %v727_v53 = vld [vmem:[#allocation8 + $0x68] sm:$0xff] }
  0xc5   :  { %637 = vmatpush.msra.mxu1 %v582_v55  ;;  %v726_v55 = vld [vmem:[#allocation8 + $0x60] sm:$0xff]  ;;  %v715_v29 = vld [vmem:[#allocation8 + $0x8] sm:$0xff] }
  0xc6   :  { %552 = vmatpush.msra.mxu0 %v409_v34  ;;  %v565_v34 = vld [vmem:[#allocation7 + $0x18] sm:$0xff]  ;;  %663 = vmatpush.msra.mxu2 %v602_v33 }
  0xc7   :  { %638 = vmatpush.msra.mxu1 %v580_v56  ;;  %v741_v56 = vld [vmem:[#allocation8 + $0xd8] sm:$0xff] }
  0xc8   :  { %553 = vmatpush.msra.mxu0 %v407_v37  ;;  %v600_v37 = vld [vmem:[#allocation7 + $0x130] sm:$0xff] }
  0xc9   :  { %639 = vmatpush.msra.mxu1 %v578_v57  ;;  %664 = vmatpush.msra.mxu2 %v600_v37  ;;  %v725_v57 = vld [vmem:[#allocation8 + $0x58] sm:$0xff] }
  0xca   :  { %554 = vmatpush.msra.mxu0 %v405_v40  ;;  %v598_v40 = vld [vmem:[#allocation7 + $0x120] sm:$0xff] }
  0xcb   :  { %640 = vmatpush.msra.mxu1 %v576_v9  ;;  %665 = vmatpush.msra.mxu2 %v598_v40 }
  0xcc   :  { %555 = vmatpush.msra.mxu0 %v403_v43  ;;  %v596_v43 = vld [vmem:[#allocation7 + $0x110] sm:$0xff] }
  0xcd   :  { %641 = vmatpush.msra.mxu1 %v574_v12  ;;  %666 = vmatpush.msra.mxu2 %v596_v43 }
  0xcf   :  { %642 = vmatpush.msra.mxu1 %v572_v16  ;;  %667 = vmatpush.msra.mxu2 %v594_v45  ;;  %v736_v16 = vld [vmem:[#allocation8 + $0xb0] sm:$0xff]  ;;  %v834_v45 = vld [vmem:[%s1099_s7] ss:$0 sm:$0xff] }
  0xd1   :  { %643 = vmatpush.msra.mxu1 %v570_v20  ;;  %v734_v20 = vld [vmem:[#allocation8 + $0xa0] sm:$0xff] }
  0xd3   :  { %644 = vmatpush.msra.mxu1 %v568_v24  ;;  %v732_v24 = vld [vmem:[#allocation8 + $0x90] sm:$0xff] }
  0xd5   :  { %645 = vmatpush.msra.mxu1 %v566_v28  ;;  %v730_v28 = vld [vmem:[#allocation8 + $0x80] sm:$0xff] }
  0xd7   :  { %646 = vmatpush.msra.mxu1 %v564_v32 }
  0xd9   :  { %647 = vmatpush.msra.mxu1 %v562_v36 }
 0x12a   :  { %v295_v59 = vpop.f32.mrf.mxu0  ;;  %v315_v60 = vpop.f32.mrf.mxu1 }
 0x12b   :  { %456 = vmatmul.f32.vlgmr.msra.gmra.mxu3 %v295_v59  ;;  %476 = vmatmul.f32.vlgmr.msrb.gmra.mxu0 %v315_v60 }
 0x12c   :  { %516 = vmatmul.f32.vlgmr.msrb.gmra.mxu2 %v295_v59  ;;  %672 = vmatpush.msra.mxu3 %v593_v58  ;;  %v740_v58 = vld [vmem:[#allocation8 + $0xd0] sm:$0xff] }
 0x12d   :  { %692 = vmatpush.msrb.mxu0 %v625_v61  ;;  %770 = vmatpush.msrb.mxu2 %v745_v47  ;;  %v724_v59 = vld [vmem:[#allocation8 + $0x50] sm:$0xff]  ;;  %v434_v61 = vld [vmem:[%s1095_s3] sm:$0x3] }
 0x12e   :  { %673 = vmatpush.msra.mxu3 %v591_v62  ;;  %v723_v62 = vld [vmem:[#allocation8 + $0x48] sm:$0xff] }
 0x12f   :  { %693 = vmatpush.msrb.mxu0 %v623_v63  ;;  %771 = vmatpush.msrb.mxu2 %v744_v48  ;;  %v738_v63 = vld [vmem:[#allocation8 + $0xc0] sm:$0xff] }
 0x130   :  { %674 = vmatpush.msra.mxu3 %v589_v0  ;;  %v436_v0 = vperm.slane %v434_v61, 0 }
 0x131   :  { %v335_v3 = vpop.f32.mrf.mxu2  ;;  %694 = vmatpush.msrb.mxu0 %v621_v1  ;;  %772 = vmatpush.msrb.mxu2 %v743_v52  ;;  %v737_v1 = vld [vmem:[#allocation8 + $0xb8] sm:$0xff] }
 0x132   :  { %496 = vmatmul.f32.vlgmr.msrb.gmra.mxu1 %v335_v3  ;;  %675 = vmatpush.msra.mxu3 %v587_v2 }
 0x133   :  { %536 = vmatmul.f32.vlgmr.msrb.gmra.mxu3 %v315_v60  ;;  %556 = vmatmul.f32.vlgmr.msra.gmra.mxu0 %v335_v3  ;;  %v739_v60 = vld [vmem:[#allocation8 + $0xc8] sm:$0xff] }
 0x134   :  { %676 = vmatpush.msra.mxu3 %v585_v4  ;;  %695 = vmatpush.msrb.mxu0 %v619_v41 }
 0x135   :  { %750 = vmatpush.msrb.mxu1 %v729_v49  ;;  %773 = vmatpush.msrb.mxu2 %v742_v54 }
 0x136   :  { %677 = vmatpush.msra.mxu3 %v583_v5  ;;  %696 = vmatpush.msrb.mxu0 %v617_v6  ;;  %v437_v5 = vperm.slane %v434_v61, 1 }
 0x137   :  { %751 = vmatpush.msrb.mxu1 %v728_v50  ;;  %774 = vmatpush.msrb.mxu2 %v741_v56 }
 0x138   :  { %678 = vmatpush.msra.mxu3 %v581_v7  ;;  %697 = vmatpush.msrb.mxu0 %v615_v11 }
 0x139   :  { %752 = vmatpush.msrb.mxu1 %v727_v53  ;;  %775 = vmatpush.msrb.mxu2 %v740_v58 }
 0x13a   :  { %679 = vmatpush.msra.mxu3 %v579_v8  ;;  %698 = vmatpush.msrb.mxu0 %v613_v15  ;;  %v722_v15 = vld [vmem:[#allocation8 + $0x40] sm:$0xff] }
 0x13b   :  { %753 = vmatpush.msrb.mxu1 %v726_v55  ;;  %776 = vmatpush.msrb.mxu2 %v739_v60 }
 0x13c   :  { %680 = vmatpush.msra.mxu3 %v577_v51  ;;  %699 = vmatpush.msrb.mxu0 %v611_v19  ;;  %v720_v19 = vld [vmem:[#allocation8 + $0x30] sm:$0xff] }
 0x13d   :  { %754 = vmatpush.msrb.mxu1 %v725_v57  ;;  %777 = vmatpush.msrb.mxu2 %v738_v63 }
 0x13e   :  { %681 = vmatpush.msra.mxu3 %v575_v14  ;;  %700 = vmatpush.msrb.mxu0 %v609_v23  ;;  %v718_v23 = vld [vmem:[#allocation8 + $0x20] sm:$0xff] }
 0x13f   :  { %755 = vmatpush.msrb.mxu1 %v724_v59  ;;  %778 = vmatpush.msrb.mxu2 %v737_v1 }
 0x140   :  { %682 = vmatpush.msra.mxu3 %v573_v18  ;;  %701 = vmatpush.msrb.mxu0 %v607_v27  ;;  %v735_v18 = vld [vmem:[#allocation8 + $0xa8] sm:$0xff]  ;;  %v716_v27 = vld [vmem:[#allocation8 + $0x10] sm:$0xff] }
 0x141   :  { %756 = vmatpush.msrb.mxu1 %v723_v62  ;;  %779 = vmatpush.msrb.mxu2 %v736_v16 }
 0x142   :  { %683 = vmatpush.msra.mxu3 %v571_v22  ;;  %702 = vmatpush.msrb.mxu0 %v605_v31  ;;  %v733_v22 = vld [vmem:[#allocation8 + $0x98] sm:$0xff]  ;;  %v626_v31 = vld [vmem:[%s1097_s5] sm:$0x3]  ;;  %s975_s5 = smov [#allocation10]  }
 0x143   :  { %757 = vmatpush.msrb.mxu1 %v722_v15  ;;  %780 = vmatpush.msrb.mxu2 %v735_v18  ;;  %v629_v32 = vperm.slane %v626_v31, 1  ;;  %s796_s1 = sshll.u32 %s975_s5, 4  ;;  %s797_s1 = int_to_ptr.vmem [resolvable:$true] %s796_s1 }
 0x144   :  { %684 = vmatpush.msra.mxu3 %v569_v26  ;;  %703 = vmatpush.msrb.mxu0 %v603_v35  ;;  %v731_v26 = vld [vmem:[#allocation8 + $0x88] sm:$0xff] }
 0x145   :  { %758 = vmatpush.msrb.mxu1 %v721_v17  ;;  %781 = vmatpush.msrb.mxu2 %v734_v20 }
 0x146   :  { %685 = vmatpush.msra.mxu3 %v567_v30  ;;  %704 = vmatpush.msrb.mxu0 %v601_v39  ;;  %v714_v30 = vld [vmem:[#allocation8] sm:$0xff] }
 0x147   :  { %759 = vmatpush.msrb.mxu1 %v720_v19  ;;  %782 = vmatpush.msrb.mxu2 %v733_v22 }
 0x148   :  { %686 = vmatpush.msra.mxu3 %v565_v34  ;;  %705 = vmatpush.msrb.mxu0 %v599_v42  ;;  %v628_v34 = vperm.slane %v626_v31, 0 }
 0x149   :  { %760 = vmatpush.msrb.mxu1 %v719_v21  ;;  %783 = vmatpush.msrb.mxu2 %v732_v24 }
 0x14a   :  { %687 = vmatpush.msra.mxu3 %v563_v38  ;;  %706 = vmatpush.msrb.mxu0 %v597_v44 }
 0x14b   :  { %761 = vmatpush.msrb.mxu1 %v718_v23  ;;  %784 = vmatpush.msrb.mxu2 %v731_v26 }
 0x14c   :  { %707 = vmatpush.msrb.mxu0 %v595_v46 }
 0x14d   :  { %762 = vmatpush.msrb.mxu1 %v717_v25  ;;  %785 = vmatpush.msrb.mxu2 %v730_v28 }
 0x14f   :  { %763 = vmatpush.msrb.mxu1 %v716_v27 }
 0x151   :  { %764 = vmatpush.msrb.mxu1 %v715_v29 }
 0x153   :  { %765 = vmatpush.msrb.mxu1 %v714_v30 }
 0x1a8   :  { %v477_v2 = vpop.f32.mrf.mxu0 }
 0x1ae   :  { %v457_v3 = vpop.f32.mrf.mxu3 }
 0x1af   :  { %v458_v4 = vadd.f32 %v457_v3, %v436_v0  ;;  %v497_v6 = vpop.f32.mrf.mxu1  ;;  %v517_v7 = vpop.f32.mrf.mxu2 }
 0x1b0   :  { %v518_v10 = vadd.f32 %v517_v7, %v437_v5  ;;  %v557_v12 = vpop.f32.mrf.mxu0 }
 0x1b1   :  { %v478_v41 = vadd.f32 %v477_v2, %v458_v4 }
 0x1b3   :  { %v498_v8 = vadd.f32 %v497_v6, %v478_v41 }
 0x1b5   :  { %v560_v9 = vmax.f32 %v498_v8, 0.0 }
 0x1b6   :  { %v537_v51 = vpop.f32.mrf.mxu3 }
 0x1b7   :  { %v538_v11 = vadd.f32 %v537_v51, %v518_v10  ;;  %648 = vmatmul.f32.vlgmr.msra.gmra.mxu1 %v560_v9  ;;  %688 = vmatmul.f32.vlgmr.msra.gmra.mxu3 %v560_v9 }
 0x1b9   :  { %v558_v13 = vadd.f32 %v557_v12, %v538_v11 }
 0x1bb   :  { %v561_v14 = vmax.f32 %v558_v13, 0.0 }
 0x1bd   :  { %668 = vmatmul.f32.vlgmr.msra.gmra.mxu2 %v561_v14  ;;  %708 = vmatmul.f32.vlgmr.msrb.gmra.mxu0 %v561_v14 }
 0x234   :  { %v649_v36 = vpop.f32.mrf.mxu1 }
 0x235   :  { %v650_v39 = vadd.f32 %v649_v36, %v628_v34 }
 0x23a   :  { %v689_v33 = vpop.f32.mrf.mxu3  ;;  %v709_v37 = vpop.f32.mrf.mxu0 }
 0x23b   :  { %v690_v35 = vadd.f32 %v689_v33, %v629_v32 }
 0x23d   :  { %v710_v38 = vadd.f32 %v709_v37, %v690_v35 }
 0x23f   :  { %v713_v40 = vmax.f32 %v710_v38, 0.0 }
 0x240   :  { %v669_v42 = vpop.f32.mrf.mxu2 }
 0x241   :  { %v670_v43 = vadd.f32 %v669_v42, %v650_v39  ;;  %786 = vmatmul.f32.vlgmr.msrb.gmra.mxu2 %v713_v40 }
 0x243   :  { %v712_v44 = vmax.f32 %v670_v43, 0.0 }
 0x245   :  { %766 = vmatmul.f32.vlgmr.msrb.gmra.mxu1 %v712_v44 }
 0x2c2   :  { %v767_v46 = vpop.f32.mrf.mxu1 }
 0x2c3   :  { %v768_v47 = vadd.f32 %v834_v45, %v767_v46 }
 0x2c4   :  { %v787_v48 = vpop.f32.mrf.mxu2 }
 0x2c5   :  { %v788_v49 = vadd.f32 %v787_v48, %v768_v47 }
 0x2c7   :  { %790 = vst [vmem:[#allocation10] sm:$0xff] %v788_v49 }
 0x2c8   :  { %801 = dma.vmem_to_hbm [thread:$0]  %s797_s1, 128, %s799_s26, [#allocation4]  }
 0x2c9   :  { %961 = dma.done.wait [#allocation4], 128  }
 0x2ca   :  { %962 = vsyncadd [#allocation4], 4294967168 }
 0x2cb   :  { %806 = vsyncpa [#allocation3], 1 }
 0x2cc   :  { %807 = vsyncpa [#allocation6], 1 }
 0x2cd   :  { %808 = vsyncpa [#allocation9], 1 }
 0x2ce   :  { %809 = vsyncpa [#allocation4], 1 }

</bundles_post_ra>
